<compile_context>
chip_gen: v7x
topology: tpu7x:2x2x1
jax: 0.10.0
libtpu: 0.0.40
codegen_flags: <defaults>
</compile_context>

<pallas_src>
import jax
import jax.numpy as jnp
from jax.experimental import pallas as pl
from jax.experimental.pallas import tpu as pltpu

LANE = 128


def _round_up(n, m):
    return ((n + m - 1) // m) * m


# ---------------------------------------------------------------------------
# Kernel: one batch tile of one network.  All refs are VMEM tiles.
#   x_ref  : (TB, IN_PAD)        f32
#   wK_ref : (dK_in, dK_out)     bf16   (net axis squeezed by BlockSpec)
#   bK_ref : (1, dK_out)         f32
#   out_ref: (TB, OUT_PAD)       f32
# ---------------------------------------------------------------------------
def ddqn_mlp_kernel(x_ref,
                    w1_ref, b1_ref,
                    w2_ref, b2_ref,
                    w3_ref, b3_ref,
                    w4_ref, b4_ref,
                    out_ref):
    # Matmuls in bf16 on the MXU (f32 accumulate); epilogue (bias + ReLU) in f32.
    x = x_ref[...].astype(jnp.bfloat16)

    h1 = jnp.dot(x, w1_ref[...], preferred_element_type=jnp.float32) + b1_ref[...]
    h1 = jnp.maximum(h1, 0.0).astype(jnp.bfloat16)

    h2 = jnp.dot(h1, w2_ref[...], preferred_element_type=jnp.float32) + b2_ref[...]
    h2 = jnp.maximum(h2, 0.0).astype(jnp.bfloat16)

    h3 = jnp.dot(h2, w3_ref[...], preferred_element_type=jnp.float32) + b3_ref[...]
    h3 = jnp.maximum(h3, 0.0).astype(jnp.bfloat16)

    h4 = jnp.dot(h3, w4_ref[...], preferred_element_type=jnp.float32) + b4_ref[...]
    out_ref[...] = h4.astype(out_ref.dtype)


# ---------------------------------------------------------------------------
# Parameter init (matches PyTorch kaiming_normal_ / constant_(bias, 0.1)).
# ---------------------------------------------------------------------------
def init_ddqn_params(key, input_size, output_size):
    dims = [input_size, 128, 256, 256, output_size]
    params = []
    for i in range(4):
        key, sub = jax.random.split(key)
        fan_in, fan_out = dims[i], dims[i + 1]
        std = (2.0 / fan_in) ** 0.5
        # PyTorch Linear weight is (out, in); we store its transpose (in, out).
        w = jax.random.normal(sub, (fan_in, fan_out), dtype=jnp.float32) * std
        b = jnp.full((1, fan_out), 0.1, dtype=jnp.float32)
        params.append((w, b))
    return params


def prepare_params(param_sets):
    """Stack N networks' params per layer, lane-pad feature dims to multiples
    of 128, and cast weights to bf16 (done once, off the hot path).

    param_sets: list (len N >= 1) of per-network lists of 4 (W, b) f32 pairs,
                W shaped (in, out), b shaped (1, out).
    Returns: list of 4 (W_stack (N, in_pad, out_pad) bf16,
                        b_stack (N, 1, out_pad)      f32) pairs.
    """
    num_layers = len(param_sets[0])
    prepped = []
    for layer in range(num_layers):
        ws, bs = [], []
        for net_params in param_sets:
            w, b = net_params[layer]
            fi, fo = w.shape
            fi_p, fo_p = _round_up(fi, LANE), _round_up(fo, LANE)
            # Zero-padding is exact: padded x columns hit zero weight rows,
            # padded output columns get zero bias and are sliced off.
            ws.append(jnp.pad(w.astype(jnp.bfloat16),
                              ((0, fi_p - fi), (0, fo_p - fo))))
            bs.append(jnp.pad(b, ((0, 0), (0, fo_p - fo))))
        prepped.append((jnp.stack(ws), jnp.stack(bs)))
    return prepped


# ---------------------------------------------------------------------------
# Forward wrappers.
# ---------------------------------------------------------------------------
def ddqn_forward_fused(x, prepped, output_size, *, block_batch=256):
    """Evaluate all N stacked networks on the same batch in one pallas_call.

    x: (batch, input_size) f32
    prepped: output of prepare_params
    Returns: (N, batch, output_size) f32
    """
    batch, in_dim = x.shape
    num_nets = prepped[0][0].shape[0]
    in_pad = prepped[0][0].shape[1]
    out_pad = prepped[-1][0].shape[2]

    # Batch tile: multiple of 8 sublanes, capped at block_batch; pad batch so
    # the grid divides evenly.
    tb = min(block_batch, _round_up(batch, 8))
    batch_pad = _round_up(batch, tb)
    num_tiles = batch_pad // tb

    x_p = jnp.zeros((batch_pad, in_pad), jnp.float32).at[:batch, :in_dim].set(x)

    # x tile changes along the (fast) batch axis; weights/biases return the
    # same block for every batch tile -> stay VMEM-resident per network.
    in_specs = [pl.BlockSpec((tb, in_pad), lambda n, i: (i, 0))]
    args = [x_p]
    for w, b in prepped:
        in_specs.append(pl.BlockSpec((None,) + w.shape[1:], lambda n, i: (n, 0, 0)))
        in_specs.append(pl.BlockSpec((None,) + b.shape[1:], lambda n, i: (n, 0, 0)))
        args.extend([w, b])
    out_spec = pl.BlockSpec((None, tb, out_pad), lambda n, i: (n, i, 0))

    layer_dims = [(w.shape[1], w.shape[2]) for (w, _) in prepped]
    flops = 2 * num_nets * batch_pad * sum(fi * fo for fi, fo in layer_dims)
    bytes_accessed = (x_p.size * 4
                      + num_nets * batch_pad * out_pad * 4
                      + sum(w.size * 2 + b.size * 4 for (w, b) in prepped))

    out_p = pl.pallas_call(
        ddqn_mlp_kernel,
        out_shape=jax.ShapeDtypeStruct((num_nets, batch_pad, out_pad), jnp.float32),
        grid=(num_nets, num_tiles),
        in_specs=in_specs,
        out_specs=out_spec,
        compiler_params=pltpu.CompilerParams(
            dimension_semantics=("parallel", "parallel")),
        cost_estimate=pl.CostEstimate(
            flops=flops, transcendentals=0, bytes_accessed=bytes_accessed),
    )(*args)

    return out_p[:, :batch, :output_size]


def ddqn_forward(x, prepped, output_size, *, block_batch=256):
    """Single-network forward, matching DDQN.forward semantics: (batch, out)."""
    return ddqn_forward_fused(x, prepped, output_size, block_batch=block_batch)[0]


def ddqn_forward_ref(x, params):
    """Pure-JAX f32 reference for correctness checking."""
    h = x
    for i, (w, b) in enumerate(params):
        h = h @ w + b
        if i < len(params) - 1:
            h = jnp.maximum(h, 0.0)
    return h


def _check_close(out, ref, rel_tol=3e-2):
    max_err = float(jnp.max(jnp.abs(out - ref)))
    scale = max(float(jnp.max(jnp.abs(ref))), 1.0)
    assert max_err <= rel_tol * scale, (max_err, scale)


# TODO(synk): replay buffer (save_memory / sample_memory) and epsilon-greedy
# sample_action are host-side control logic, not kernel work; omitted here.

if __name__ == "__main__":
    key = jax.random.PRNGKey(0)

    batch = 128          # >= 128 rows so the MXU M-dimension is actually used
    input_size = 16
    output_size = 4

    key, k_online, k_target, k_x = jax.random.split(key, 4)
    online_params = init_ddqn_params(k_online, input_size, output_size)
    target_params = init_ddqn_params(k_target, input_size, output_size)
    x = jax.random.normal(k_x, (batch, input_size), dtype=jnp.float32)

    # Single-network forward (the nn.Module's forward).
    prepped_single = prepare_params([online_params])
    out = jax.block_until_ready(ddqn_forward(x, prepped_single, output_size))
    assert out.shape == (batch, output_size)
    ref_online = ddqn_forward_ref(x, online_params)
    _check_close(out, ref_online)

    # Fused online + target evaluation in one pallas_call (DDQN Q-target phase).
    prepped_pair = prepare_params([online_params, target_params])
    out_pair = jax.block_until_ready(
        ddqn_forward_fused(x, prepped_pair, output_size))
    assert out_pair.shape == (2, batch, output_size)
    _check_close(out_pair[0], ref_online)
    _check_close(out_pair[1], ddqn_forward_ref(x, target_params))

    print("KERNEL_OK")
</pallas_src>

<mosaic_0001>
module attributes {stable_mosaic.version = 11 : i64} {
  func.func @ddqn_mlp_kernel(%arg0: i32, %arg1: i32, %arg2: memref<128x128xf32, #tpu.memory_space<vmem>>, %arg3: memref<1x128x128xbf16, #tpu.memory_space<vmem>>, %arg4: memref<1x1x128xf32, #tpu.memory_space<vmem>>, %arg5: memref<1x128x256xbf16, #tpu.memory_space<vmem>>, %arg6: memref<1x1x256xf32, #tpu.memory_space<vmem>>, %arg7: memref<1x256x256xbf16, #tpu.memory_space<vmem>>, %arg8: memref<1x1x256xf32, #tpu.memory_space<vmem>>, %arg9: memref<1x256x128xbf16, #tpu.memory_space<vmem>>, %arg10: memref<1x1x128xf32, #tpu.memory_space<vmem>>, %arg11: memref<1x128x128xf32, #tpu.memory_space<vmem>>) attributes {dimension_semantics = [#tpu.dimension_semantics<parallel>, #tpu.dimension_semantics<parallel>], iteration_bounds = array<i64: 1, 1>, scalar_prefetch = 0 : i64, scratch_operands = 0 : i64, tpu.core_type = #tpu.core_type<tc>, window_params = [{transform_indices = @transform_0, window_bounds = array<i64: 128, 128>}, {transform_indices = @transform_1, window_bounds = array<i64: 1, 128, 128>}, {transform_indices = @transform_2, window_bounds = array<i64: 1, 1, 128>}, {transform_indices = @transform_3, window_bounds = array<i64: 1, 128, 256>}, {transform_indices = @transform_4, window_bounds = array<i64: 1, 1, 256>}, {transform_indices = @transform_5, window_bounds = array<i64: 1, 256, 256>}, {transform_indices = @transform_6, window_bounds = array<i64: 1, 1, 256>}, {transform_indices = @transform_7, window_bounds = array<i64: 1, 256, 128>}, {transform_indices = @transform_8, window_bounds = array<i64: 1, 1, 128>}, {transform_indices = @transform_9, window_bounds = array<i64: 1, 128, 128>}]} {
    %c0 = arith.constant 0 : index
    %c0_0 = arith.constant 0 : index
    %0 = vector.load %arg2[%c0, %c0_0] : memref<128x128xf32, #tpu.memory_space<vmem>>, vector<128x128xf32>
    %1 = arith.truncf %0 : vector<128x128xf32> to vector<128x128xbf16>
    %c0_1 = arith.constant 0 : index
    %c0_2 = arith.constant 0 : index
    %c0_3 = arith.constant 0 : index
    %2 = vector.load %arg3[%c0_1, %c0_2, %c0_3] : memref<1x128x128xbf16, #tpu.memory_space<vmem>>, vector<1x128x128xbf16>
    %3 = vector.shape_cast %2 : vector<1x128x128xbf16> to vector<128x128xbf16>
    %cst = arith.constant dense<0.000000e+00> : vector<128x128xf32>
    %4 = tpu.matmul %1, %3, %cst {dimension_numbers = #tpu.dot_dimension_numbers<[1], [0], [0], [1], [0, 0, 1, 1], [], []>} : vector<128x128xbf16>, vector<128x128xbf16>, vector<128x128xf32> -> vector<128x128xf32>
    %c0_4 = arith.constant 0 : index
    %c0_5 = arith.constant 0 : index
    %c0_6 = arith.constant 0 : index
    %5 = vector.load %arg4[%c0_4, %c0_5, %c0_6] : memref<1x1x128xf32, #tpu.memory_space<vmem>>, vector<1x1x128xf32>
    %6 = vector.shape_cast %5 : vector<1x1x128xf32> to vector<1x128xf32>
    %7 = vector.broadcast %6 : vector<1x128xf32> to vector<128x128xf32>
    %8 = arith.addf %4, %7 : vector<128x128xf32>
    %cst_7 = arith.constant 0.000000e+00 : f32
    %9 = vector.broadcast %cst_7 : f32 to vector<128x128xf32>
    %10 = arith.maximumf %8, %9 : vector<128x128xf32>
    %11 = arith.truncf %10 : vector<128x128xf32> to vector<128x128xbf16>
    %c0_8 = arith.constant 0 : index
    %c0_9 = arith.constant 0 : index
    %c0_10 = arith.constant 0 : index
    %12 = vector.load %arg5[%c0_8, %c0_9, %c0_10] : memref<1x128x256xbf16, #tpu.memory_space<vmem>>, vector<1x128x256xbf16>
    %13 = vector.shape_cast %12 : vector<1x128x256xbf16> to vector<128x256xbf16>
    %cst_11 = arith.constant dense<0.000000e+00> : vector<128x256xf32>
    %14 = tpu.matmul %11, %13, %cst_11 {dimension_numbers = #tpu.dot_dimension_numbers<[1], [0], [0], [1], [0, 0, 1, 1], [], []>} : vector<128x128xbf16>, vector<128x256xbf16>, vector<128x256xf32> -> vector<128x256xf32>
    %c0_12 = arith.constant 0 : index
    %c0_13 = arith.constant 0 : index
    %c0_14 = arith.constant 0 : index
    %15 = vector.load %arg6[%c0_12, %c0_13, %c0_14] : memref<1x1x256xf32, #tpu.memory_space<vmem>>, vector<1x1x256xf32>
    %16 = vector.shape_cast %15 : vector<1x1x256xf32> to vector<1x256xf32>
    %17 = vector.broadcast %16 : vector<1x256xf32> to vector<128x256xf32>
    %18 = arith.addf %14, %17 : vector<128x256xf32>
    %cst_15 = arith.constant 0.000000e+00 : f32
    %19 = vector.broadcast %cst_15 : f32 to vector<128x256xf32>
    %20 = arith.maximumf %18, %19 : vector<128x256xf32>
    %21 = arith.truncf %20 : vector<128x256xf32> to vector<128x256xbf16>
    %c0_16 = arith.constant 0 : index
    %c0_17 = arith.constant 0 : index
    %c0_18 = arith.constant 0 : index
    %22 = vector.load %arg7[%c0_16, %c0_17, %c0_18] : memref<1x256x256xbf16, #tpu.memory_space<vmem>>, vector<1x256x256xbf16>
    %23 = vector.shape_cast %22 : vector<1x256x256xbf16> to vector<256x256xbf16>
    %cst_19 = arith.constant dense<0.000000e+00> : vector<128x256xf32>
    %24 = tpu.matmul %21, %23, %cst_19 {dimension_numbers = #tpu.dot_dimension_numbers<[1], [0], [0], [1], [0, 0, 1, 1], [], []>} : vector<128x256xbf16>, vector<256x256xbf16>, vector<128x256xf32> -> vector<128x256xf32>
    %c0_20 = arith.constant 0 : index
    %c0_21 = arith.constant 0 : index
    %c0_22 = arith.constant 0 : index
    %25 = vector.load %arg8[%c0_20, %c0_21, %c0_22] : memref<1x1x256xf32, #tpu.memory_space<vmem>>, vector<1x1x256xf32>
    %26 = vector.shape_cast %25 : vector<1x1x256xf32> to vector<1x256xf32>
    %27 = vector.broadcast %26 : vector<1x256xf32> to vector<128x256xf32>
    %28 = arith.addf %24, %27 : vector<128x256xf32>
    %cst_23 = arith.constant 0.000000e+00 : f32
    %29 = vector.broadcast %cst_23 : f32 to vector<128x256xf32>
    %30 = arith.maximumf %28, %29 : vector<128x256xf32>
    %31 = arith.truncf %30 : vector<128x256xf32> to vector<128x256xbf16>
    %c0_24 = arith.constant 0 : index
    %c0_25 = arith.constant 0 : index
    %c0_26 = arith.constant 0 : index
    %32 = vector.load %arg9[%c0_24, %c0_25, %c0_26] : memref<1x256x128xbf16, #tpu.memory_space<vmem>>, vector<1x256x128xbf16>
    %33 = vector.shape_cast %32 : vector<1x256x128xbf16> to vector<256x128xbf16>
    %cst_27 = arith.constant dense<0.000000e+00> : vector<128x128xf32>
    %34 = tpu.matmul %31, %33, %cst_27 {dimension_numbers = #tpu.dot_dimension_numbers<[1], [0], [0], [1], [0, 0, 1, 1], [], []>} : vector<128x256xbf16>, vector<256x128xbf16>, vector<128x128xf32> -> vector<128x128xf32>
    %c0_28 = arith.constant 0 : index
    %c0_29 = arith.constant 0 : index
    %c0_30 = arith.constant 0 : index
    %35 = vector.load %arg10[%c0_28, %c0_29, %c0_30] : memref<1x1x128xf32, #tpu.memory_space<vmem>>, vector<1x1x128xf32>
    %36 = vector.shape_cast %35 : vector<1x1x128xf32> to vector<1x128xf32>
    %37 = vector.broadcast %36 : vector<1x128xf32> to vector<128x128xf32>
    %38 = arith.addf %34, %37 : vector<128x128xf32>
    %c0_31 = arith.constant 0 : index
    %c0_32 = arith.constant 0 : index
    %c0_33 = arith.constant 0 : index
    %39 = vector.load %arg11[%c0_31, %c0_32, %c0_33] : memref<1x128x128xf32, #tpu.memory_space<vmem>>, vector<1x128x128xf32>
    %40 = vector.shape_cast %39 : vector<1x128x128xf32> to vector<128x128xf32>
    %41 = vector.shape_cast %38 : vector<128x128xf32> to vector<1x128x128xf32>
    tpu.vector_store %arg11[%c0_31, %c0_32, %c0_33], %41 {strides = array<i32>} : memref<1x128x128xf32, #tpu.memory_space<vmem>>, vector<1x128x128xf32>,
    return
  }
  func.func @transform_0(%arg0: i32, %arg1: i32) -> (i32, i32) {
    %c0_i32 = arith.constant 0 : i32
    %c0_i32_0 = arith.constant 0 : i32
    return %arg1, %c0_i32 : i32, i32
  }
  func.func @transform_1(%arg0: i32, %arg1: i32) -> (i32, i32, i32) {
    %c0_i32 = arith.constant 0 : i32
    %c0_i32_0 = arith.constant 0 : i32
    %c0_i32_1 = arith.constant 0 : i32
    return %arg0, %c0_i32, %c0_i32_0 : i32, i32, i32
  }
  func.func @transform_2(%arg0: i32, %arg1: i32) -> (i32, i32, i32) {
    %c0_i32 = arith.constant 0 : i32
    %c0_i32_0 = arith.constant 0 : i32
    %c0_i32_1 = arith.constant 0 : i32
    return %arg0, %c0_i32, %c0_i32_0 : i32, i32, i32
  }
  func.func @transform_3(%arg0: i32, %arg1: i32) -> (i32, i32, i32) {
    %c0_i32 = arith.constant 0 : i32
    %c0_i32_0 = arith.constant 0 : i32
    %c0_i32_1 = arith.constant 0 : i32
    return %arg0, %c0_i32, %c0_i32_0 : i32, i32, i32
  }
  func.func @transform_4(%arg0: i32, %arg1: i32) -> (i32, i32, i32) {
    %c0_i32 = arith.constant 0 : i32
    %c0_i32_0 = arith.constant 0 : i32
    %c0_i32_1 = arith.constant 0 : i32
    return %arg0, %c0_i32, %c0_i32_0 : i32, i32, i32
  }
  func.func @transform_5(%arg0: i32, %arg1: i32) -> (i32, i32, i32) {
    %c0_i32 = arith.constant 0 : i32
    %c0_i32_0 = arith.constant 0 : i32
    %c0_i32_1 = arith.constant 0 : i32
    return %arg0, %c0_i32, %c0_i32_0 : i32, i32, i32
  }
  func.func @transform_6(%arg0: i32, %arg1: i32) -> (i32, i32, i32) {
    %c0_i32 = arith.constant 0 : i32
    %c0_i32_0 = arith.constant 0 : i32
    %c0_i32_1 = arith.constant 0 : i32
    return %arg0, %c0_i32, %c0_i32_0 : i32, i32, i32
  }
  func.func @transform_7(%arg0: i32, %arg1: i32) -> (i32, i32, i32) {
    %c0_i32 = arith.constant 0 : i32
    %c0_i32_0 = arith.constant 0 : i32
    %c0_i32_1 = arith.constant 0 : i32
    return %arg0, %c0_i32, %c0_i32_0 : i32, i32, i32
  }
  func.func @transform_8(%arg0: i32, %arg1: i32) -> (i32, i32, i32) {
    %c0_i32 = arith.constant 0 : i32
    %c0_i32_0 = arith.constant 0 : i32
    %c0_i32_1 = arith.constant 0 : i32
    return %arg0, %c0_i32, %c0_i32_0 : i32, i32, i32
  }
  func.func @transform_9(%arg0: i32, %arg1: i32) -> (i32, i32, i32) {
    %c0_i32 = arith.constant 0 : i32
    %c0_i32_0 = arith.constant 0 : i32
    return %arg0, %arg1, %c0_i32 : i32, i32, i32
  }
}

</mosaic_0001>

<bundles_post_ra>
// kernel: tpu_custom_call.1
= control target key start
LH: loop header
LB: loop body
LE: loop exit
PB: predicated region body
PF: predicated region fallthrough
CT: control target
= control target key end

     0   :  { %14 = vsyncpa [#allocation3], 0  ;;  %s1925_s0 = inlined_call_operand.hbm [shape: f32[128,128], index: 0, kind: input, shape index: {}]   ;;  %s1926_s1 = inlined_call_operand.hbm [shape: bf16[1,128,128], index: 1, kind: input, shape index: {}]   ;;  %s1927_s2 = inlined_call_operand.vmem [shape: f32[1,1,128], index: 2, kind: input, shape index: {}]   ;;  %s1928_s3 = inlined_call_operand.hbm [shape: bf16[1,128,256], index: 3, kind: input, shape index: {}]   ;;  %s1929_s4 = inlined_call_operand.vmem [shape: f32[1,1,256], index: 4, kind: input, shape index: {}]   ;;  %s1930_s5 = inlined_call_operand.hbm [shape: bf16[1,256,256], index: 5, kind: input, shape index: {}]   ;;  %s1931_s6 = inlined_call_operand.vmem [shape: f32[1,1,256], index: 6, kind: input, shape index: {}]   ;;  %s1932_s7 = inlined_call_operand.hbm [shape: bf16[1,256,128], index: 7, kind: input, shape index: {}]   ;;  %s1933_s8 = inlined_call_operand.vmem [shape: f32[1,1,128], index: 8, kind: input, shape index: {}]   ;;  %s1934_s9 = inlined_call_operand.hbm [shape: f32[1,128,128], index: 9, kind: output, shape index: {}]  }
   0x1   :  { %15 = vsyncpa [#allocation6], 0 }
   0x2   :  { %16 = vsyncpa [#allocation9], 0 }
   0x3   :  { %17 = vsyncpa [#allocation4], 0  ;;  %s1652_s30 = smov [#allocation5]   ;;  %s1512_s13 = scalar_lea.hbm %s1926_s1, 1024 }
   0x4   :  { %s35_s10 = sshll.u32 %s1652_s30, 4  ;;  %p1513_p0 = scmp.ne.s32.totalorder %s1926_s1, %s1512_s13  ;;  %s36_s10 = int_to_ptr.vmem [resolvable:$true] %s35_s10 }
   0x5   :  { %p1516_p1 = scmp.lt.u32.totalorder %s1512_s13, %s1926_s1 }
   0x7   :  { %p1518_p2 = pnand %p1516_p1, %p1513_p0 }
   0x9   :  { %1521 = shalt.err (!%p1518_p2)
}
   0xa   :  { %s1522_s18 = scalar_lea.vmem %s36_s10, 1024  ;;  %p1527_p4 = scmp.lt.s32.totalorder %s36_s10, %s36_s10 }
   0xb   :  { %p1523_p3 = scmp.ne.s32.totalorder %s36_s10, %s1522_s18  ;;  %p1528_p5 = scmp.lt.s32.totalorder %s1522_s18, %s1522_s18 }
   0xd   :  { %p1529_p6 = por %p1528_p5, %p1527_p4 }
   0xf   :  { %p1530_p7 = pnand %p1529_p6, %p1523_p3 }
  0x11   :  { %1533 = shalt.err (!%p1530_p7)
}
  0x12   :  { %s1653_s19 = smov 64   ;;  %s1654_s20 = smov 4  }
  0x13   :  { %41 = dma.hbm_to_vmem [thread:$0]  %s1926_s1, 1024, %s36_s10, [#allocation6], %s1653_s19, %s1653_s19, %s1654_s20  }
  0x14   :  { %s1655_s23 = smov [#allocation8]   ;;  %s1656_s25 = smov [#allocation2]  }
  0x15   :  { %s63_s24 = sshll.u32 %s1655_s23, 4  ;;  %s23_s26 = sshll.u32 %s1656_s25, 4  ;;  %s64_s24 = int_to_ptr.vmem [resolvable:$true] %s63_s24  ;;  %s24_s26 = int_to_ptr.vmem [resolvable:$true] %s23_s26 }
  0x16   :  { %s1534_s29 = scalar_lea.hbm %s1930_s5, 4096 }
  0x17   :  { %p1535_p8 = scmp.ne.s32.totalorder %s1930_s5, %s1534_s29  ;;  %p1538_p9 = scmp.lt.u32.totalorder %s1534_s29, %s1930_s5 }
  0x19   :  { %p1540_p10 = pnand %p1538_p9, %p1535_p8 }
  0x1b   :  { %1543 = shalt.err (!%p1540_p10)
}
  0x1c   :  { %s1544_s1 = scalar_lea.vmem %s64_s24, 4096  ;;  %p1549_p12 = scmp.lt.s32.totalorder %s64_s24, %s64_s24 }
  0x1d   :  { %p1545_p11 = scmp.ne.s32.totalorder %s64_s24, %s1544_s1  ;;  %p1550_p13 = scmp.lt.s32.totalorder %s1544_s1, %s1544_s1 }
  0x1f   :  { %p1551_p0 = por %p1550_p13, %p1549_p12 }
  0x21   :  { %p1552_p1 = pnand %p1551_p0, %p1545_p11 }
  0x23   :  { %1555 = shalt.err (!%p1552_p1)
}
  0x24   :  { %s1657_s10 = smov 128   ;;  %s1658_s14 = smov 8  }
  0x25   :  { %69 = dma.hbm_to_vmem [thread:$0]  %s1930_s5, 4096, %s64_s24, [#allocation9], %s1657_s10, %s1657_s10, %s1658_s14  }
  0x26   :  { %s1556_s21 = scalar_lea.hbm %s1925_s0, 2048 }
  0x27   :  { %p1557_p2 = scmp.ne.s32.totalorder %s1925_s0, %s1556_s21  ;;  %p1560_p3 = scmp.lt.u32.totalorder %s1556_s21, %s1925_s0 }
  0x29   :  { %p1562_p4 = pnand %p1560_p3, %p1557_p2 }
  0x2b   :  { %1565 = shalt.err (!%p1562_p4)
}
  0x2c   :  { %s1566_s28 = scalar_lea.vmem %s24_s26, 2048  ;;  %p1571_p6 = scmp.lt.s32.totalorder %s24_s26, %s24_s26 }
  0x2d   :  { %p1567_p5 = scmp.ne.s32.totalorder %s24_s26, %s1566_s28  ;;  %p1572_p7 = scmp.lt.s32.totalorder %s1566_s28, %s1566_s28 }
  0x2f   :  { %p1573_p8 = por %p1572_p7, %p1571_p6 }
  0x31   :  { %p1574_p9 = pnand %p1573_p8, %p1567_p5 }
  0x33   :  { %1577 = shalt.err (!%p1574_p9)
}
  0x34   :  { %29 = dma.hbm_to_vmem [thread:$0]  %s1925_s0, 2048, %s24_s26, [#allocation3], %s1657_s10, %s1657_s10, %s1658_s14  }
  0x35   :  { %s1659_s29 = smov [#allocation7]   ;;  %s1660_s11 = smov [#allocation10]  }
  0x36   :  { %s49_s30 = sshll.u32 %s1659_s29, 4  ;;  %s77_s12 = sshll.u32 %s1660_s11, 4  ;;  %s50_s30 = int_to_ptr.vmem [resolvable:$true] %s49_s30  ;;  %s78_s12 = int_to_ptr.vmem [resolvable:$true] %s77_s12 }
  0x37   :  { %s1578_s15 = scalar_lea.hbm %s1928_s3, 2048 }
  0x38   :  { %p1579_p10 = scmp.ne.s32.totalorder %s1928_s3, %s1578_s15  ;;  %p1582_p11 = scmp.lt.u32.totalorder %s1578_s15, %s1928_s3 }
  0x3a   :  { %p1584_p12 = pnand %p1582_p11, %p1579_p10 }
  0x3c   :  { %1587 = shalt.err (!%p1584_p12)
}
  0x3d   :  { %s1588_s0 = scalar_lea.vmem %s50_s30, 2048  ;;  %p1593_p0 = scmp.lt.s32.totalorder %s50_s30, %s50_s30 }
  0x3e   :  { %p1589_p13 = scmp.ne.s32.totalorder %s50_s30, %s1588_s0  ;;  %p1594_p1 = scmp.lt.s32.totalorder %s1588_s0, %s1588_s0 }
  0x40   :  { %p1595_p2 = por %p1594_p1, %p1593_p0 }
  0x42   :  { %p1596_p3 = pnand %p1595_p2, %p1589_p13 }
  0x44   :  { %1599 = shalt.err (!%p1596_p3)
}
  0x45   :  { %55 = dma.hbm_to_vmem [thread:$0]  %s1928_s3, 2048, %s50_s30, [#allocation6], %s1657_s10, %s1657_s10, %s1658_s14  }
  0x46   :  { %s1600_s27 = scalar_lea.hbm %s1932_s7, 2048 }
  0x47   :  { %p1601_p4 = scmp.ne.s32.totalorder %s1932_s7, %s1600_s27  ;;  %p1604_p5 = scmp.lt.u32.totalorder %s1600_s27, %s1932_s7 }
  0x49   :  { %p1606_p6 = pnand %p1604_p5, %p1601_p4 }
  0x4b   :  { %1609 = shalt.err (!%p1606_p6)
}
  0x4c   :  { %s1610_s11 = scalar_lea.vmem %s78_s12, 2048  ;;  %p1615_p8 = scmp.lt.s32.totalorder %s78_s12, %s78_s12 }
  0x4d   :  { %p1611_p7 = scmp.ne.s32.totalorder %s78_s12, %s1610_s11  ;;  %p1616_p9 = scmp.lt.s32.totalorder %s1610_s11, %s1610_s11 }
  0x4f   :  { %p1617_p10 = por %p1616_p9, %p1615_p8 }
  0x51   :  { %p1618_p11 = pnand %p1617_p10, %p1611_p7 }
  0x53   :  { %1621 = shalt.err (!%p1618_p11)
}
  0x54   :  { %83 = dma.hbm_to_vmem [thread:$0]  %s1932_s7, 2048, %s78_s12, [#allocation9], %s1653_s19, %s1653_s19, %s1654_s20  }
  0x55   :  { %1644 = dma.done.wait [#allocation3], 2048  }
  0x56   :  { %1645 = vsyncadd [#allocation3], 4294965248 }
  0x57   :  { %1646 = dma.done.wait [#allocation6], 3072  }
  0x58   :  { %1647 = vsyncadd [#allocation6], 4294964224 }
  0x59   :  { %1648 = dma.done.wait [#allocation9], 6144  }
  0x5a   :  { %1649 = vsyncadd [#allocation9], 4294961152  ;;  %v1416_v0 = vld [vmem:[#allocation5] sm:$0xff]   ;;  %v1417_v1 = vld [vmem:[#allocation5 + $0x8] sm:$0xff]   ;;  %v1661_v48 = vmov 0  }
  0x5b   :  { %1373 = vmatprep.subr.bf16.mxu0 %v1416_v0  ;;  %v1418_v2 = vld [vmem:[#allocation5 + $0x10] sm:$0xff]   ;;  %v1419_v3 = vld [vmem:[#allocation5 + $0x18] sm:$0xff]   ;;  %v102_v4 = vld [vmem:[#allocation2] sm:$0xff]  ;;  %458 = vmatprep.mubr.bf16.mxu1 %v1661_v48 }
  0x5c   :  { %1374 = vmatpush3.bf16.msra.mxu0 %v1416_v0  ;;  %v103_v5 = vld [vmem:[#allocation2 + $0x8] sm:$0xff]  ;;  %v1420_v7 = vld [vmem:[#allocation5 + $0x20] sm:$0xff]   ;;  %v1427_v10 = vld [vmem:[#allocation7 + $0x14] ss:$8 sps:$4 sm:$0xff]  }
  0x5d   :  { %1375 = vmatprep.subr.bf16.mxu0 %v1417_v1  ;;  %v118_v6 = vpack.c.bf16 %v103_v5, %v102_v4  ;;  %v1424_v8 = vld [vmem:[#allocation7 + $0x4] ss:$8 sps:$4 sm:$0xff]   ;;  %v1426_v9 = vld [vmem:[#allocation7] ss:$8 sps:$4 sm:$0xff]   ;;  %v1429_v12 = vld [vmem:[#allocation7 + $0x10] ss:$8 sps:$4 sm:$0xff]  }
  0x5e   :  { %v1421_v11 = vld [vmem:[#allocation5 + $0x28] sm:$0xff]   ;;  %426 = vmatprep.subr.bf16.mxu1 %v1424_v8  ;;  %v1422_v14 = vld [vmem:[#allocation5 + $0x30] sm:$0xff]   ;;  %v1423_v17 = vld [vmem:[#allocation5 + $0x38] sm:$0xff]  }
  0x5f   :  { %1389 = vmatprep.mubr.bf16.mxu0 %v118_v6  ;;  %427 = vmatpush1.bf16.msra.mxu1 %v1426_v9  ;;  %v1430_v13 = vld [vmem:[#allocation7 + $0x24] ss:$8 sps:$4 sm:$0xff]   ;;  %v1432_v15 = vld [vmem:[#allocation7 + $0x20] ss:$8 sps:$4 sm:$0xff]   ;;  %v1433_v16 = vld [vmem:[#allocation7 + $0x34] ss:$8 sps:$4 sm:$0xff]  }
  0x60   :  { %1376 = vmatpush3.bf16.msra.mxu0 %v1417_v1  ;;  %428 = vmatprep.subr.bf16.mxu1 %v1427_v10  ;;  %v1435_v18 = vld [vmem:[#allocation7 + $0x30] ss:$8 sps:$4 sm:$0xff]   ;;  %v1436_v19 = vld [vmem:[#allocation7 + $0x44] ss:$8 sps:$4 sm:$0xff]   ;;  %v1438_v24 = vld [vmem:[#allocation7 + $0x40] ss:$8 sps:$4 sm:$0xff]  }
  0x61   :  { %1377 = vmatprep.subr.bf16.mxu0 %v1418_v2  ;;  %v104_v20 = vld [vmem:[#allocation2 + $0x10] sm:$0xff]  ;;  %v105_v21 = vld [vmem:[#allocation2 + $0x18] sm:$0xff]  ;;  %v106_v22 = vld [vmem:[#allocation2 + $0x20] sm:$0xff] }
  0x62   :  { %v107_v23 = vld [vmem:[#allocation2 + $0x28] sm:$0xff]  ;;  %v1439_v25 = vld [vmem:[#allocation7 + $0x54] ss:$8 sps:$4 sm:$0xff]   ;;  %v119_v26 = vpack.c.bf16 %v105_v21, %v104_v20  ;;  %v1441_v28 = vld [vmem:[#allocation7 + $0x50] ss:$8 sps:$4 sm:$0xff]  }
  0x63   :  { %429 = vmatpush1.bf16.msra.mxu1 %v1429_v12  ;;  %v120_v27 = vpack.c.bf16 %v107_v23, %v106_v22  ;;  %v108_v29 = vld [vmem:[#allocation2 + $0x30] sm:$0xff]  ;;  %v109_v30 = vld [vmem:[#allocation2 + $0x38] sm:$0xff]  ;;  %v110_v31 = vld [vmem:[#allocation2 + $0x40] sm:$0xff] }
  0x64   :  { %1378 = vmatpush3.bf16.msra.mxu0 %v1418_v2  ;;  %430 = vmatprep.subr.bf16.mxu1 %v1430_v13  ;;  %v111_v32 = vld [vmem:[#allocation2 + $0x48] sm:$0xff]  ;;  %v121_v33 = vpack.c.bf16 %v109_v30, %v108_v29  ;;  %v112_v35 = vld [vmem:[#allocation2 + $0x50] sm:$0xff]  ;;  %v113_v36 = vld [vmem:[#allocation2 + $0x58] sm:$0xff] }
  0x65   :  { %1379 = vmatprep.subr.bf16.mxu0 %v1419_v3  ;;  %v122_v34 = vpack.c.bf16 %v111_v32, %v110_v31  ;;  %v114_v37 = vld [vmem:[#allocation2 + $0x60] sm:$0xff]  ;;  %v115_v38 = vld [vmem:[#allocation2 + $0x68] sm:$0xff]  ;;  %v123_v39 = vpack.c.bf16 %v113_v36, %v112_v35  ;;  %v116_v41 = vld [vmem:[#allocation2 + $0x70] sm:$0xff] }
  0x66   :  { %v124_v40 = vpack.c.bf16 %v115_v38, %v114_v37  ;;  %v117_v42 = vld [vmem:[#allocation2 + $0x78] sm:$0xff]  ;;  %v1442_v44 = vld [vmem:[#allocation7 + $0x64] ss:$8 sps:$4 sm:$0xff]   ;;  %v1444_v45 = vld [vmem:[#allocation7 + $0x60] ss:$8 sps:$4 sm:$0xff]  }
  0x67   :  { %431 = vmatpush1.bf16.msra.mxu1 %v1432_v15  ;;  %v125_v43 = vpack.c.bf16 %v117_v42, %v116_v41  ;;  %v1445_v46 = vld [vmem:[#allocation7 + $0x74] ss:$8 sps:$4 sm:$0xff]   ;;  %v1447_v47 = vld [vmem:[#allocation7 + $0x70] ss:$8 sps:$4 sm:$0xff]   ;;  %v1448_v49 = vld [vmem:[#allocation8] ss:$8 sps:$4 sm:$0xff]  }
  0x68   :  { %1380 = vmatpush3.bf16.msra.mxu0 %v1419_v3  ;;  %432 = vmatprep.subr.bf16.mxu1 %v1433_v16  ;;  %v1450_v50 = vld [vmem:[#allocation8 + $0x4] ss:$8 sps:$4 sm:$0xff]   ;;  %v1453_v51 = vld [vmem:[#allocation8 + $0x14] ss:$8 sps:$4 sm:$0xff]   ;;  %v1451_v52 = vld [vmem:[#allocation8 + $0x10] ss:$8 sps:$4 sm:$0xff]  }
  0x69   :  { %1381 = vmatprep.subr.bf16.mxu0 %v1420_v7  ;;  %v1456_v53 = vld [vmem:[#allocation8 + $0x24] ss:$8 sps:$4 sm:$0xff]   ;;  %v1454_v54 = vld [vmem:[#allocation8 + $0x20] ss:$8 sps:$4 sm:$0xff]   ;;  %v1459_v55 = vld [vmem:[#allocation8 + $0x34] ss:$8 sps:$4 sm:$0xff]  }
  0x6a   :  { %v1457_v56 = vld [vmem:[#allocation8 + $0x30] ss:$8 sps:$4 sm:$0xff]   ;;  %v1462_v57 = vld [vmem:[#allocation8 + $0x44] ss:$8 sps:$4 sm:$0xff]   ;;  %v1460_v58 = vld [vmem:[#allocation8 + $0x40] ss:$8 sps:$4 sm:$0xff]  }
  0x6b   :  { %433 = vmatpush1.bf16.msra.mxu1 %v1435_v18  ;;  %v1465_v59 = vld [vmem:[#allocation8 + $0x54] ss:$8 sps:$4 sm:$0xff]   ;;  %v1463_v60 = vld [vmem:[#allocation8 + $0x50] ss:$8 sps:$4 sm:$0xff]   ;;  %v1468_v61 = vld [vmem:[#allocation8 + $0x64] ss:$8 sps:$4 sm:$0xff]  }
  0x6c   :  { %1382 = vmatpush3.bf16.msra.mxu0 %v1420_v7  ;;  %434 = vmatprep.subr.bf16.mxu1 %v1436_v19  ;;  %v1466_v62 = vld [vmem:[#allocation8 + $0x60] ss:$8 sps:$4 sm:$0xff]   ;;  %v1471_v63 = vld [vmem:[#allocation8 + $0x74] ss:$8 sps:$4 sm:$0xff]   ;;  %v1469_v0 = vld [vmem:[#allocation8 + $0x70] ss:$8 sps:$4 sm:$0xff]  }
  0x6d   :  { %1383 = vmatprep.subr.bf16.mxu0 %v1421_v11  ;;  %v1474_v1 = vld [vmem:[#allocation8 + $0x84] ss:$8 sps:$4 sm:$0xff]   ;;  %v1472_v2 = vld [vmem:[#allocation8 + $0x80] ss:$8 sps:$4 sm:$0xff]   ;;  %v1477_v3 = vld [vmem:[#allocation8 + $0x94] ss:$8 sps:$4 sm:$0xff]  }
  0x6e   :  { %v1475_v4 = vld [vmem:[#allocation8 + $0x90] ss:$8 sps:$4 sm:$0xff]   ;;  %v1480_v5 = vld [vmem:[#allocation8 + $0xa4] ss:$8 sps:$4 sm:$0xff]   ;;  %v1478_v6 = vld [vmem:[#allocation8 + $0xa0] ss:$8 sps:$4 sm:$0xff]  }
  0x6f   :  { %435 = vmatpush1.bf16.msra.mxu1 %v1438_v24  ;;  %v1483_v7 = vld [vmem:[#allocation8 + $0xb4] ss:$8 sps:$4 sm:$0xff]   ;;  %v1481_v8 = vld [vmem:[#allocation8 + $0xb0] ss:$8 sps:$4 sm:$0xff]   ;;  %v1486_v9 = vld [vmem:[#allocation8 + $0xc4] ss:$8 sps:$4 sm:$0xff]  }
  0x70   :  { %1384 = vmatpush3.bf16.msra.mxu0 %v1421_v11  ;;  %436 = vmatprep.subr.bf16.mxu1 %v1439_v25  ;;  %v1484_v10 = vld [vmem:[#allocation8 + $0xc0] ss:$8 sps:$4 sm:$0xff]   ;;  %v1489_v11 = vld [vmem:[#allocation8 + $0xd4] ss:$8 sps:$4 sm:$0xff]   ;;  %v1487_v12 = vld [vmem:[#allocation8 + $0xd0] ss:$8 sps:$4 sm:$0xff]  }
  0x71   :  { %1385 = vmatprep.subr.bf16.mxu0 %v1422_v14  ;;  %v1219_v13 = vld [vmem:[%s1927_s2] ss:$0 sm:$0xff] }
  0x73   :  { %437 = vmatpush1.bf16.msra.mxu1 %v1441_v28 }
  0x74   :  { %1386 = vmatpush3.bf16.msra.mxu0 %v1422_v14  ;;  %438 = vmatprep.subr.bf16.mxu1 %v1442_v44 }
  0x75   :  { %1387 = vmatprep.subr.bf16.mxu0 %v1423_v17 }
  0x77   :  { %439 = vmatpush1.bf16.msra.mxu1 %v1444_v45 }
  0x78   :  { %1388 = vmatpush3.bf16.msra.mxu0 %v1423_v17  ;;  %440 = vmatprep.subr.bf16.mxu1 %v1445_v46 }
  0x79   :  { %791 = vmatprep.subr.bf16.mxu0 %v1450_v50 }
  0x7b   :  { %1390 = vmatmul.mubr.bf16.vlgmr.msra.gmra.mrb[0].mxu0 %v119_v26  ;;  %441 = vmatpush1.bf16.msra.mxu1 %v1447_v47 }
  0x7c   :  { %1393 = vmatprep.mubr.bf16.mxu0 %v120_v27  ;;  %792 = vmatpush1.bf16.msra.mxu0 %v1448_v49 }
  0x7d   :  { %793 = vmatprep.subr.bf16.mxu0 %v1453_v51 }
  0x80   :  { %794 = vmatpush1.bf16.msra.mxu0 %v1451_v52 }
  0x81   :  { %795 = vmatprep.subr.bf16.mxu0 %v1456_v53 }
  0x83   :  { %1394 = vmatmul.mubr.bf16.gmra.mrb[4].mxu0 %v121_v33 }
  0x84   :  { %1397 = vmatprep.mubr.bf16.mxu0 %v122_v34  ;;  %796 = vmatpush1.bf16.msra.mxu0 %v1454_v54 }
  0x85   :  { %797 = vmatprep.subr.bf16.mxu0 %v1459_v55 }
  0x88   :  { %798 = vmatpush1.bf16.msra.mxu0 %v1457_v56 }
  0x89   :  { %799 = vmatprep.subr.bf16.mxu0 %v1462_v57 }
  0x8b   :  { %1398 = vmatmul.mubr.bf16.gmra.mrb[8].mxu0 %v123_v39 }
  0x8c   :  { %1401 = vmatprep.mubr.bf16.mxu0 %v124_v40  ;;  %800 = vmatpush1.bf16.msra.mxu0 %v1460_v58 }
  0x8d   :  { %801 = vmatprep.subr.bf16.mxu0 %v1465_v59 }
  0x90   :  { %802 = vmatpush1.bf16.msra.mxu0 %v1463_v60 }
  0x91   :  { %803 = vmatprep.subr.bf16.mxu0 %v1468_v61 }
  0x93   :  { %1402 = vmatmul.mubr.bf16.gmra.mrb[12].mxu0 %v125_v43 }
  0x94   :  { %804 = vmatpush1.bf16.msra.mxu0 %v1466_v62 }
  0x95   :  { %805 = vmatprep.subr.bf16.mxu0 %v1471_v63 }
  0x98   :  { %806 = vmatpush1.bf16.msra.mxu0 %v1469_v0 }
  0x99   :  { %807 = vmatprep.subr.bf16.mxu0 %v1474_v1 }
  0x9c   :  { %808 = vmatpush1.bf16.msra.mxu0 %v1472_v2 }
  0x9d   :  { %809 = vmatprep.subr.bf16.mxu0 %v1477_v3 }
  0xa0   :  { %810 = vmatpush1.bf16.msra.mxu0 %v1475_v4 }
  0xa1   :  { %811 = vmatprep.subr.bf16.mxu0 %v1480_v5 }
  0xa4   :  { %812 = vmatpush1.bf16.msra.mxu0 %v1478_v6 }
  0xa5   :  { %813 = vmatprep.subr.bf16.mxu0 %v1483_v7  ;;  %v1492_v7 = vld [vmem:[#allocation8 + $0xe4] ss:$8 sps:$4 sm:$0xff]  }
  0xa8   :  { %814 = vmatpush1.bf16.msra.mxu0 %v1481_v8  ;;  %v1490_v8 = vld [vmem:[#allocation8 + $0xe0] ss:$8 sps:$4 sm:$0xff]  }
  0xa9   :  { %815 = vmatprep.subr.bf16.mxu0 %v1486_v9  ;;  %v1495_v9 = vld [vmem:[#allocation8 + $0xf4] ss:$8 sps:$4 sm:$0xff]  }
  0xac   :  { %816 = vmatpush1.bf16.msra.mxu0 %v1484_v10  ;;  %v1493_v10 = vld [vmem:[#allocation8 + $0xf0] ss:$8 sps:$4 sm:$0xff]  }
  0xad   :  { %817 = vmatprep.subr.bf16.mxu0 %v1489_v11  ;;  %v1496_v11 = vld [vmem:[#allocation10 + $0x40] sm:$0xff]  }
  0xae   :  { %1309 = vmatprep.subr.bf16.mxu1 %v1496_v11 }
  0xb0   :  { %818 = vmatpush1.bf16.msra.mxu0 %v1487_v12  ;;  %v1497_v12 = vld [vmem:[#allocation10] sm:$0xff]  }
  0xb1   :  { %819 = vmatprep.subr.bf16.mxu0 %v1492_v7 }
  0xb4   :  { %820 = vmatpush1.bf16.msra.mxu0 %v1490_v8 }
  0xb5   :  { %821 = vmatprep.subr.bf16.mxu0 %v1495_v9 }
  0xb8   :  { %822 = vmatpush1.bf16.msra.mxu0 %v1493_v10 }
 0x14e   :  { %v1391_v14 = vpop.f32.mrb[0].mxu0 }
 0x14f   :  { %v240_v15 = vadd.f32 %v1391_v14, %v1219_v13  ;;  %v231_v16 = vpop.f32.mrb[1].mxu0  ;;  %v1499_v14 = vld [vmem:[#allocation10 + $0x8] sm:$0xff]  }
 0x150   :  { %v232_v17 = vadd.f32 %v1219_v13, %v231_v16  ;;  %v1392_v18 = vpop.f32.mrb[2].mxu0  ;;  %v1501_v16 = vld [vmem:[#allocation10 + $0x10] sm:$0xff]  }
 0x151   :  { %v243_v19 = vadd.f32 %v1392_v18, %v1219_v13  ;;  %v234_v20 = vpop.f32.mrb[3].mxu0  ;;  %v296_v22 = vmax.f32 %v240_v15, 0.0  ;;  %v1500_v15 = vld [vmem:[#allocation10 + $0x50] sm:$0xff]   ;;  %v1504_v18 = vld [vmem:[#allocation10 + $0x60] sm:$0xff]  }
 0x152   :  { %v235_v21 = vadd.f32 %v1219_v13, %v234_v20  ;;  %v294_v24 = vmax.f32 %v232_v17, 0.0  ;;  %v1503_v17 = vld [vmem:[#allocation10 + $0x18] sm:$0xff]   ;;  %v1506_v20 = vld [vmem:[#allocation10 + $0x68] sm:$0xff]  }
 0x153   :  { %v297_v23 = vmax.f32 %v243_v19, 0.0  ;;  %v1505_v19 = vld [vmem:[#allocation10 + $0x20] sm:$0xff]  }
 0x154   :  { %v295_v25 = vmax.f32 %v235_v21, 0.0  ;;  %v1507_v21 = vld [vmem:[#allocation10 + $0x28] sm:$0xff]  }
 0x155   :  { %v311_v26 = vpack.c.bf16 %v297_v23, %v296_v22  ;;  %v1508_v22 = vld [vmem:[#allocation10 + $0x70] sm:$0xff]  }
 0x156   :  { %v310_v27 = vpack.c.bf16 %v295_v25, %v294_v24  ;;  %v1395_v28 = vpop.f32.mrb[4].mxu0  ;;  %v1509_v23 = vld [vmem:[#allocation10 + $0x30] sm:$0xff]   ;;  %v336_v24 = vlaneseq }
 0x157   :  { %v256_v29 = vadd.f32 %v1395_v28, %v1219_v13  ;;  %v247_v30 = vpop.f32.mrb[5].mxu0 }
 0x158   :  { %459 = vmatmul.mubr.bf16.vlgmr.msra.gmra.mrb[0].mxu1 %v310_v27  ;;  %v248_v31 = vadd.f32 %v1219_v13, %v247_v30  ;;  %v1396_v32 = vpop.f32.mrb[6].mxu0  ;;  %v1799_v25 = vshrl.u32 %v336_v24, 7  ;;  %v334_v27 = vld [vmem:[%s1929_s4] sm:$0x3] }
 0x159   :  { %v300_v33 = vmax.f32 %v256_v29, 0.0  ;;  %v259_v34 = vadd.f32 %v1396_v32, %v1219_v13  ;;  %v250_v35 = vpop.f32.mrb[7].mxu0  ;;  %468 = vmatprep.mubr.bf16.mxu1 %v1661_v48  ;;  %1310 = vmatpush3.bf16.msra.mxu1 %v1497_v12 }
 0x15a   :  { %v298_v36 = vmax.f32 %v248_v31, 0.0  ;;  %v251_v37 = vadd.f32 %v1219_v13, %v250_v35  ;;  %v342_v28 = vsub.s32 1, %v1799_v25 }
 0x15b   :  { %v301_v38 = vmax.f32 %v259_v34, 0.0 }
 0x15c   :  { %v299_v39 = vmax.f32 %v251_v37, 0.0  ;;  %v1812_v30 = vrot.slane %v334_v27, %v342_v28 }
 0x15d   :  { %v313_v40 = vpack.c.bf16 %v301_v38, %v300_v33 }
 0x15e   :  { %v312_v41 = vpack.c.bf16 %v299_v39, %v298_v36  ;;  %v1399_v42 = vpop.f32.mrb[8].mxu0 }
 0x15f   :  { %v272_v43 = vadd.f32 %v1399_v42, %v1219_v13  ;;  %v263_v44 = vpop.f32.mrb[9].mxu0 }
 0x160   :  { %469 = vmatmul.mubr.bf16.gmra.mrb[4].mxu1 %v311_v26  ;;  %v264_v45 = vadd.f32 %v1219_v13, %v263_v44  ;;  %v1400_v46 = vpop.f32.mrb[10].mxu0  ;;  %v338_v26 = vsub.s32 0, %v1799_v25 }
 0x161   :  { %478 = vmatprep.mubr.bf16.mxu1 %v1661_v48  ;;  %v304_v47 = vmax.f32 %v272_v43, 0.0  ;;  %v275_v49 = vadd.f32 %v1400_v46, %v1219_v13  ;;  %v266_v50 = vpop.f32.mrb[11].mxu0 }
 0x162   :  { %v302_v51 = vmax.f32 %v264_v45, 0.0  ;;  %v267_v52 = vadd.f32 %v1219_v13, %v266_v50  ;;  %v1808_v29 = vrot.slane %v334_v27, %v338_v26 }
 0x163   :  { %v305_v53 = vmax.f32 %v275_v49, 0.0 }
 0x164   :  { %v303_v54 = vmax.f32 %v267_v52, 0.0 }
 0x165   :  { %v315_v55 = vpack.c.bf16 %v305_v53, %v304_v47 }
 0x166   :  { %v314_v56 = vpack.c.bf16 %v303_v54, %v302_v51  ;;  %v1403_v57 = vpop.f32.mrb[12].mxu0 }
 0x167   :  { %v288_v58 = vadd.f32 %v1403_v57, %v1219_v13  ;;  %v279_v59 = vpop.f32.mrb[13].mxu0 }
 0x168   :  { %479 = vmatmul.mubr.bf16.gmra.mrb[8].mxu1 %v312_v41  ;;  %v280_v60 = vadd.f32 %v1219_v13, %v279_v59  ;;  %v1404_v61 = vpop.f32.mrb[14].mxu0 }
 0x169   :  { %488 = vmatprep.mubr.bf16.mxu1 %v1661_v48  ;;  %v308_v62 = vmax.f32 %v288_v58, 0.0  ;;  %v291_v63 = vadd.f32 %v1404_v61, %v1219_v13  ;;  %v282_v0 = vpop.f32.mrb[15].mxu0 }
 0x16a   :  { %v306_v1 = vmax.f32 %v280_v60, 0.0  ;;  %v283_v2 = vadd.f32 %v1219_v13, %v282_v0  ;;  %v1498_v13 = vld [vmem:[#allocation10 + $0x48] sm:$0xff]  }
 0x16b   :  { %v309_v3 = vmax.f32 %v291_v63, 0.0  ;;  %1311 = vmatprep.subr.bf16.mxu1 %v1498_v13 }
 0x16c   :  { %v307_v4 = vmax.f32 %v283_v2, 0.0  ;;  %1312 = vmatpush3.bf16.msra.mxu1 %v1499_v14 }
 0x16d   :  { %v317_v5 = vpack.c.bf16 %v309_v3, %v308_v62  ;;  %1313 = vmatprep.subr.bf16.mxu1 %v1500_v15 }
 0x16e   :  { %v316_v6 = vpack.c.bf16 %v307_v4, %v306_v1 }
 0x170   :  { %489 = vmatmul.mubr.bf16.gmra.mrb[12].mxu1 %v313_v40 }
 0x171   :  { %498 = vmatprep.mubr.bf16.mxu1 %v1661_v48  ;;  %1314 = vmatpush3.bf16.msra.mxu1 %v1501_v16 }
 0x178   :  { %499 = vmatmul.mubr.bf16.gmra.mrb[16].mxu1 %v314_v56 }
 0x179   :  { %508 = vmatprep.mubr.bf16.mxu1 %v1661_v48 }
 0x180   :  { %509 = vmatmul.mubr.bf16.gmra.mrb[20].mxu1 %v315_v55 }
 0x181   :  { %518 = vmatprep.mubr.bf16.mxu1 %v1661_v48 }
 0x188   :  { %519 = vmatmul.mubr.bf16.gmra.mrb[24].mxu1 %v316_v6 }
 0x189   :  { %528 = vmatprep.mubr.bf16.mxu1 %v1661_v48  ;;  %v1502_v48 = vld [vmem:[#allocation10 + $0x58] sm:$0xff]  }
 0x18a   :  { %1315 = vmatprep.subr.bf16.mxu1 %v1502_v48 }
 0x18b   :  { %1316 = vmatpush3.bf16.msra.mxu1 %v1503_v17 }
 0x18c   :  { %1317 = vmatprep.subr.bf16.mxu1 %v1504_v18 }
 0x18f   :  { %1318 = vmatpush3.bf16.msra.mxu1 %v1505_v19 }
 0x190   :  { %529 = vmatmul.mubr.bf16.gmra.mrb[28].mxu1 %v317_v5  ;;  %1319 = vmatprep.subr.bf16.mxu1 %v1506_v20 }
 0x193   :  { %1320 = vmatpush3.bf16.msra.mxu1 %v1507_v21 }
 0x194   :  { %1321 = vmatprep.subr.bf16.mxu1 %v1508_v22 }
 0x197   :  { %1322 = vmatpush3.bf16.msra.mxu1 %v1509_v23 }
 0x22b   :  { %v460_v31 = vpop.f32.mrb[0].mxu1 }
 0x22c   :  { %v461_v32 = vadd.f32 %v460_v31, %v1808_v29  ;;  %v462_v33 = vpop.f32.mrb[1].mxu1 }
 0x22d   :  { %v463_v34 = vadd.f32 %v462_v33, %v1812_v30  ;;  %v464_v35 = vpop.f32.mrb[2].mxu1 }
 0x22e   :  { %v465_v36 = vadd.f32 %v464_v35, %v1808_v29  ;;  %v466_v37 = vpop.f32.mrb[3].mxu1  ;;  %v539_v39 = vmax.f32 %v461_v32, 0.0 }
 0x22f   :  { %v467_v38 = vadd.f32 %v466_v37, %v1812_v30  ;;  %v540_v41 = vmax.f32 %v463_v34, 0.0 }
 0x230   :  { %v541_v40 = vmax.f32 %v465_v36, 0.0 }
 0x231   :  { %v542_v42 = vmax.f32 %v467_v38, 0.0 }
 0x232   :  { %v571_v43 = vpack.c.bf16 %v541_v40, %v539_v39 }
 0x233   :  { %v572_v44 = vpack.c.bf16 %v542_v42, %v540_v41  ;;  %v470_v45 = vpop.f32.mrb[4].mxu1 }
 0x234   :  { %v471_v46 = vadd.f32 %v470_v45, %v1808_v29  ;;  %v472_v47 = vpop.f32.mrb[5].mxu1 }
 0x235   :  { %v473_v49 = vadd.f32 %v472_v47, %v1812_v30  ;;  %v474_v50 = vpop.f32.mrb[6].mxu1  ;;  %823 = vmatprep.mubr.bf16.mxu0 %v572_v44 }
 0x236   :  { %v475_v51 = vadd.f32 %v474_v50, %v1808_v29  ;;  %v476_v52 = vpop.f32.mrb[7].mxu1  ;;  %824 = vmatmul.mubr.bf16.vlgmr.msra.gmra.mrb[16].mxu0 %v571_v43  ;;  %v543_v54 = vmax.f32 %v471_v46, 0.0 }
 0x237   :  { %v477_v53 = vadd.f32 %v476_v52, %v1812_v30  ;;  %v544_v56 = vmax.f32 %v473_v49, 0.0 }
 0x238   :  { %v545_v55 = vmax.f32 %v475_v51, 0.0 }
 0x239   :  { %v546_v57 = vmax.f32 %v477_v53, 0.0 }
 0x23a   :  { %v573_v58 = vpack.c.bf16 %v545_v55, %v543_v54 }
 0x23b   :  { %v574_v59 = vpack.c.bf16 %v546_v57, %v544_v56  ;;  %v480_v60 = vpop.f32.mrb[8].mxu1 }
 0x23c   :  { %v481_v61 = vadd.f32 %v480_v60, %v1808_v29  ;;  %v482_v62 = vpop.f32.mrb[9].mxu1 }
 0x23d   :  { %v483_v63 = vadd.f32 %v482_v62, %v1812_v30  ;;  %v484_v0 = vpop.f32.mrb[10].mxu1  ;;  %833 = vmatprep.mubr.bf16.mxu0 %v574_v59 }
 0x23e   :  { %v485_v1 = vadd.f32 %v484_v0, %v1808_v29  ;;  %v486_v2 = vpop.f32.mrb[11].mxu1  ;;  %834 = vmatmul.mubr.bf16.gmra.mrb[20].mxu0 %v573_v58  ;;  %v547_v4 = vmax.f32 %v481_v61, 0.0 }
 0x23f   :  { %v487_v3 = vadd.f32 %v486_v2, %v1812_v30  ;;  %v548_v6 = vmax.f32 %v483_v63, 0.0 }
 0x240   :  { %v549_v5 = vmax.f32 %v485_v1, 0.0 }
 0x241   :  { %v550_v7 = vmax.f32 %v487_v3, 0.0 }
 0x242   :  { %v575_v8 = vpack.c.bf16 %v549_v5, %v547_v4 }
 0x243   :  { %v576_v9 = vpack.c.bf16 %v550_v7, %v548_v6  ;;  %v490_v10 = vpop.f32.mrb[12].mxu1 }
 0x244   :  { %v491_v11 = vadd.f32 %v490_v10, %v1808_v29  ;;  %v492_v12 = vpop.f32.mrb[13].mxu1 }
 0x245   :  { %v493_v13 = vadd.f32 %v492_v12, %v1812_v30  ;;  %v494_v14 = vpop.f32.mrb[14].mxu1  ;;  %843 = vmatprep.mubr.bf16.mxu0 %v576_v9 }
 0x246   :  { %v495_v15 = vadd.f32 %v494_v14, %v1808_v29  ;;  %v496_v16 = vpop.f32.mrb[15].mxu1  ;;  %844 = vmatmul.mubr.bf16.gmra.mrb[24].mxu0 %v575_v8  ;;  %v551_v17 = vmax.f32 %v491_v11, 0.0 }
 0x247   :  { %v497_v48 = vadd.f32 %v496_v16, %v1812_v30  ;;  %v552_v19 = vmax.f32 %v493_v13, 0.0 }
 0x248   :  { %v553_v18 = vmax.f32 %v495_v15, 0.0 }
 0x249   :  { %v554_v20 = vmax.f32 %v497_v48, 0.0 }
 0x24a   :  { %v577_v21 = vpack.c.bf16 %v553_v18, %v551_v17 }
 0x24b   :  { %v578_v22 = vpack.c.bf16 %v554_v20, %v552_v19  ;;  %v500_v23 = vpop.f32.mrb[16].mxu1  ;;  %v1510_v20 = vld [vmem:[#allocation10 + $0x78] sm:$0xff]  }
 0x24c   :  { %v501_v24 = vadd.f32 %v500_v23, %v1808_v29  ;;  %v502_v27 = vpop.f32.mrb[17].mxu1  ;;  %1323 = vmatprep.subr.bf16.mxu1 %v1510_v20 }
 0x24d   :  { %v503_v31 = vadd.f32 %v502_v27, %v1812_v30  ;;  %v504_v32 = vpop.f32.mrb[18].mxu1  ;;  %853 = vmatprep.mubr.bf16.mxu0 %v578_v22 }
 0x24e   :  { %v505_v33 = vadd.f32 %v504_v32, %v1808_v29  ;;  %v506_v34 = vpop.f32.mrb[19].mxu1  ;;  %854 = vmatmul.mubr.bf16.gmra.mrb[28].mxu0 %v577_v21  ;;  %v555_v36 = vmax.f32 %v501_v24, 0.0  ;;  %v1511_v21 = vld [vmem:[#allocation10 + $0x38] sm:$0xff]  }
 0x24f   :  { %v507_v35 = vadd.f32 %v506_v34, %v1812_v30  ;;  %v556_v38 = vmax.f32 %v503_v31, 0.0  ;;  %1324 = vmatpush3.bf16.msra.mxu1 %v1511_v21 }
 0x250   :  { %v557_v37 = vmax.f32 %v505_v33, 0.0 }
 0x251   :  { %v558_v39 = vmax.f32 %v507_v35, 0.0 }
 0x252   :  { %v579_v40 = vpack.c.bf16 %v557_v37, %v555_v36 }
 0x253   :  { %v580_v41 = vpack.c.bf16 %v558_v39, %v556_v38  ;;  %v510_v42 = vpop.f32.mrb[20].mxu1 }
 0x254   :  { %v511_v43 = vadd.f32 %v510_v42, %v1808_v29  ;;  %v512_v44 = vpop.f32.mrb[21].mxu1 }
 0x255   :  { %v513_v45 = vadd.f32 %v512_v44, %v1812_v30  ;;  %v514_v46 = vpop.f32.mrb[22].mxu1  ;;  %863 = vmatprep.mubr.bf16.mxu0 %v580_v41 }
 0x256   :  { %v515_v47 = vadd.f32 %v514_v46, %v1808_v29  ;;  %v516_v49 = vpop.f32.mrb[23].mxu1  ;;  %864 = vmatmul.mubr.bf16.gmra.mrb[32].mxu0 %v579_v40  ;;  %v559_v51 = vmax.f32 %v511_v43, 0.0 }
 0x257   :  { %v517_v50 = vadd.f32 %v516_v49, %v1812_v30  ;;  %v560_v53 = vmax.f32 %v513_v45, 0.0 }
 0x258   :  { %v561_v52 = vmax.f32 %v515_v47, 0.0 }
 0x259   :  { %v562_v54 = vmax.f32 %v517_v50, 0.0 }
 0x25a   :  { %v581_v55 = vpack.c.bf16 %v561_v52, %v559_v51 }
 0x25b   :  { %v582_v56 = vpack.c.bf16 %v562_v54, %v560_v53  ;;  %v520_v57 = vpop.f32.mrb[24].mxu1 }
 0x25c   :  { %v521_v58 = vadd.f32 %v520_v57, %v1808_v29  ;;  %v522_v59 = vpop.f32.mrb[25].mxu1 }
 0x25d   :  { %v523_v60 = vadd.f32 %v522_v59, %v1812_v30  ;;  %v524_v61 = vpop.f32.mrb[26].mxu1  ;;  %873 = vmatprep.mubr.bf16.mxu0 %v582_v56 }
 0x25e   :  { %v525_v62 = vadd.f32 %v524_v61, %v1808_v29  ;;  %v526_v63 = vpop.f32.mrb[27].mxu1  ;;  %874 = vmatmul.mubr.bf16.gmra.mrb[36].mxu0 %v581_v55  ;;  %v563_v1 = vmax.f32 %v521_v58, 0.0 }
 0x25f   :  { %v527_v0 = vadd.f32 %v526_v63, %v1812_v30  ;;  %v564_v3 = vmax.f32 %v523_v60, 0.0 }
 0x260   :  { %v565_v2 = vmax.f32 %v525_v62, 0.0 }
 0x261   :  { %v566_v4 = vmax.f32 %v527_v0, 0.0 }
 0x262   :  { %v583_v5 = vpack.c.bf16 %v565_v2, %v563_v1 }
 0x263   :  { %v584_v6 = vpack.c.bf16 %v566_v4, %v564_v3  ;;  %v530_v7 = vpop.f32.mrb[28].mxu1 }
 0x264   :  { %v531_v8 = vadd.f32 %v530_v7, %v1808_v29  ;;  %v532_v9 = vpop.f32.mrb[29].mxu1 }
 0x265   :  { %v533_v10 = vadd.f32 %v532_v9, %v1812_v30  ;;  %v534_v11 = vpop.f32.mrb[30].mxu1  ;;  %883 = vmatprep.mubr.bf16.mxu0 %v584_v6 }
 0x266   :  { %v535_v12 = vadd.f32 %v534_v11, %v1808_v29  ;;  %v536_v13 = vpop.f32.mrb[31].mxu1  ;;  %884 = vmatmul.mubr.bf16.gmra.mrb[40].mxu0 %v583_v5  ;;  %v567_v15 = vmax.f32 %v531_v8, 0.0  ;;  %v619_v29 = vld [vmem:[%s1931_s6] sm:$0x3] }
 0x267   :  { %v537_v14 = vadd.f32 %v536_v13, %v1812_v30  ;;  %v568_v48 = vmax.f32 %v533_v10, 0.0  ;;  %v1851_v22 = vrot.slane %v619_v29, %v338_v26  ;;  %v1855_v30 = vrot.slane %v619_v29, %v342_v28 }
 0x268   :  { %v569_v16 = vmax.f32 %v535_v12, 0.0 }
 0x269   :  { %v570_v17 = vmax.f32 %v537_v14, 0.0 }
 0x26a   :  { %v585_v18 = vpack.c.bf16 %v569_v16, %v567_v15 }
 0x26b   :  { %v586_v19 = vpack.c.bf16 %v570_v17, %v568_v48 }
 0x26d   :  { %893 = vmatprep.mubr.bf16.mxu0 %v586_v19 }
 0x26e   :  { %894 = vmatmul.mubr.bf16.gmra.mrb[44].mxu0 %v585_v18 }
 0x309   :  { %v825_v23 = vpop.f32.mrb[16].mxu0 }
 0x30a   :  { %v826_v24 = vadd.f32 %v825_v23, %v1851_v22  ;;  %v827_v27 = vpop.f32.mrb[17].mxu0 }
 0x30b   :  { %v828_v31 = vadd.f32 %v827_v27, %v1855_v30  ;;  %v829_v32 = vpop.f32.mrb[18].mxu0 }
 0x30c   :  { %v830_v33 = vadd.f32 %v829_v32, %v1851_v22  ;;  %v831_v34 = vpop.f32.mrb[19].mxu0  ;;  %v904_v36 = vmax.f32 %v826_v24, 0.0 }
 0x30d   :  { %v832_v35 = vadd.f32 %v831_v34, %v1855_v30  ;;  %v905_v26 = vmax.f32 %v828_v31, 0.0 }
 0x30e   :  { %v906_v37 = vmax.f32 %v830_v33, 0.0 }
 0x30f   :  { %v907_v38 = vmax.f32 %v832_v35, 0.0 }
 0x310   :  { %v936_v39 = vpack.c.bf16 %v906_v37, %v904_v36 }
 0x311   :  { %v937_v25 = vpack.c.bf16 %v907_v38, %v905_v26  ;;  %v835_v28 = vpop.f32.mrb[20].mxu0 }
 0x312   :  { %v836_v40 = vadd.f32 %v835_v28, %v1851_v22  ;;  %v837_v41 = vpop.f32.mrb[21].mxu0 }
 0x313   :  { %v838_v42 = vadd.f32 %v837_v41, %v1855_v30  ;;  %v839_v43 = vpop.f32.mrb[22].mxu0  ;;  %1119 = vmatprep.mubr.bf16.mxu1 %v937_v25 }
 0x314   :  { %v840_v44 = vadd.f32 %v839_v43, %v1851_v22  ;;  %v841_v45 = vpop.f32.mrb[23].mxu0  ;;  %1120 = vmatmul.mubr.bf16.vlgmr.msra.gmra.mrb[32].mxu1 %v936_v39  ;;  %v908_v47 = vmax.f32 %v836_v40, 0.0 }
 0x315   :  { %v842_v46 = vadd.f32 %v841_v45, %v1855_v30  ;;  %v909_v50 = vmax.f32 %v838_v42, 0.0 }
 0x316   :  { %v910_v49 = vmax.f32 %v840_v44, 0.0 }
 0x317   :  { %v911_v51 = vmax.f32 %v842_v46, 0.0 }
 0x318   :  { %v938_v52 = vpack.c.bf16 %v910_v49, %v908_v47 }
 0x319   :  { %v939_v53 = vpack.c.bf16 %v911_v51, %v909_v50  ;;  %v845_v54 = vpop.f32.mrb[24].mxu0 }
 0x31a   :  { %v846_v55 = vadd.f32 %v845_v54, %v1851_v22  ;;  %v847_v56 = vpop.f32.mrb[25].mxu0 }
 0x31b   :  { %v848_v57 = vadd.f32 %v847_v56, %v1855_v30  ;;  %v849_v58 = vpop.f32.mrb[26].mxu0  ;;  %1127 = vmatprep.mubr.bf16.mxu1 %v939_v53 }
 0x31c   :  { %v850_v59 = vadd.f32 %v849_v58, %v1851_v22  ;;  %v851_v60 = vpop.f32.mrb[27].mxu0  ;;  %1128 = vmatmul.mubr.bf16.gmra.mrb[36].mxu1 %v938_v52  ;;  %v912_v62 = vmax.f32 %v846_v55, 0.0 }
 0x31d   :  { %v852_v61 = vadd.f32 %v851_v60, %v1855_v30  ;;  %v913_v0 = vmax.f32 %v848_v57, 0.0 }
 0x31e   :  { %v914_v63 = vmax.f32 %v850_v59, 0.0 }
 0x31f   :  { %v915_v1 = vmax.f32 %v852_v61, 0.0 }
 0x320   :  { %v940_v2 = vpack.c.bf16 %v914_v63, %v912_v62 }
 0x321   :  { %v941_v3 = vpack.c.bf16 %v915_v1, %v913_v0  ;;  %v855_v4 = vpop.f32.mrb[28].mxu0 }
 0x322   :  { %v856_v5 = vadd.f32 %v855_v4, %v1851_v22  ;;  %v857_v6 = vpop.f32.mrb[29].mxu0 }
 0x323   :  { %v858_v7 = vadd.f32 %v857_v6, %v1855_v30  ;;  %v859_v8 = vpop.f32.mrb[30].mxu0  ;;  %1135 = vmatprep.mubr.bf16.mxu1 %v941_v3 }
 0x324   :  { %v860_v9 = vadd.f32 %v859_v8, %v1851_v22  ;;  %v861_v10 = vpop.f32.mrb[31].mxu0  ;;  %1136 = vmatmul.mubr.bf16.gmra.mrb[40].mxu1 %v940_v2  ;;  %v916_v12 = vmax.f32 %v856_v5, 0.0 }
 0x325   :  { %v862_v11 = vadd.f32 %v861_v10, %v1855_v30  ;;  %v917_v14 = vmax.f32 %v858_v7, 0.0 }
 0x326   :  { %v918_v13 = vmax.f32 %v860_v9, 0.0 }
 0x327   :  { %v919_v15 = vmax.f32 %v862_v11, 0.0 }
 0x328   :  { %v942_v16 = vpack.c.bf16 %v918_v13, %v916_v12  ;;  %v1892_v13 = vld [vmem:[%s1933_s8] ss:$0 sm:$0xff]  ;;  %s1662_s8 = smov [#allocation11]  }
 0x329   :  { %v943_v48 = vpack.c.bf16 %v919_v15, %v917_v14  ;;  %v865_v17 = vpop.f32.mrb[32].mxu0  ;;  %s1205_s1 = sshll.u32 %s1662_s8, 4  ;;  %s1206_s1 = int_to_ptr.vmem [resolvable:$true] %s1205_s1 }
 0x32a   :  { %v866_v18 = vadd.f32 %v865_v17, %v1851_v22  ;;  %v867_v19 = vpop.f32.mrb[33].mxu0  ;;  %s1622_s15 = scalar_lea.vmem %s1206_s1, 2048  ;;  %p1627_p13 = scmp.lt.s32.totalorder %s1206_s1, %s1206_s1 }
 0x32b   :  { %v868_v20 = vadd.f32 %v867_v19, %v1855_v30  ;;  %v869_v21 = vpop.f32.mrb[34].mxu0  ;;  %1143 = vmatprep.mubr.bf16.mxu1 %v943_v48  ;;  %p1623_p12 = scmp.ne.s32.totalorder %s1206_s1, %s1622_s15  ;;  %p1628_p0 = scmp.lt.s32.totalorder %s1622_s15, %s1622_s15 }
 0x32c   :  { %v870_v29 = vadd.f32 %v869_v21, %v1851_v22  ;;  %v871_v23 = vpop.f32.mrb[35].mxu0  ;;  %1144 = vmatmul.mubr.bf16.gmra.mrb[44].mxu1 %v942_v16  ;;  %v920_v27 = vmax.f32 %v866_v18, 0.0 }
 0x32d   :  { %v872_v24 = vadd.f32 %v871_v23, %v1855_v30  ;;  %v921_v32 = vmax.f32 %v868_v20, 0.0  ;;  %p1629_p1 = por %p1628_p0, %p1627_p13 }
 0x32e   :  { %v922_v31 = vmax.f32 %v870_v29, 0.0 }
 0x32f   :  { %v923_v33 = vmax.f32 %v872_v24, 0.0  ;;  %p1630_p2 = pnand %p1629_p1, %p1623_p12 }
 0x330   :  { %v944_v34 = vpack.c.bf16 %v922_v31, %v920_v27 }
 0x331   :  { %v945_v35 = vpack.c.bf16 %v923_v33, %v921_v32  ;;  %v875_v36 = vpop.f32.mrb[36].mxu0 }
 0x332   :  { %v876_v37 = vadd.f32 %v875_v36, %v1851_v22  ;;  %v877_v26 = vpop.f32.mrb[37].mxu0 }
 0x333   :  { %v878_v38 = vadd.f32 %v877_v26, %v1855_v30  ;;  %v879_v39 = vpop.f32.mrb[38].mxu0  ;;  %1151 = vmatprep.mubr.bf16.mxu1 %v945_v35 }
 0x334   :  { %v880_v25 = vadd.f32 %v879_v39, %v1851_v22  ;;  %v881_v28 = vpop.f32.mrb[39].mxu0  ;;  %1152 = vmatmul.mubr.bf16.gmra.mrb[48].mxu1 %v944_v34  ;;  %v924_v41 = vmax.f32 %v876_v37, 0.0 }
 0x335   :  { %v882_v40 = vadd.f32 %v881_v28, %v1855_v30  ;;  %v925_v43 = vmax.f32 %v878_v38, 0.0 }
 0x336   :  { %v926_v42 = vmax.f32 %v880_v25, 0.0 }
 0x337   :  { %v927_v44 = vmax.f32 %v882_v40, 0.0 }
 0x338   :  { %v946_v45 = vpack.c.bf16 %v926_v42, %v924_v41 }
 0x339   :  { %v947_v46 = vpack.c.bf16 %v927_v44, %v925_v43  ;;  %v885_v47 = vpop.f32.mrb[40].mxu0 }
 0x33a   :  { %v886_v49 = vadd.f32 %v885_v47, %v1851_v22  ;;  %v887_v50 = vpop.f32.mrb[41].mxu0 }
 0x33b   :  { %v888_v51 = vadd.f32 %v887_v50, %v1855_v30  ;;  %v889_v52 = vpop.f32.mrb[42].mxu0  ;;  %1159 = vmatprep.mubr.bf16.mxu1 %v947_v46 }
 0x33c   :  { %v890_v53 = vadd.f32 %v889_v52, %v1851_v22  ;;  %v891_v54 = vpop.f32.mrb[43].mxu0  ;;  %1160 = vmatmul.mubr.bf16.gmra.mrb[52].mxu1 %v946_v45  ;;  %v928_v56 = vmax.f32 %v886_v49, 0.0 }
 0x33d   :  { %v892_v55 = vadd.f32 %v891_v54, %v1855_v30  ;;  %v929_v58 = vmax.f32 %v888_v51, 0.0 }
 0x33e   :  { %v930_v57 = vmax.f32 %v890_v53, 0.0 }
 0x33f   :  { %v931_v59 = vmax.f32 %v892_v55, 0.0 }
 0x340   :  { %v948_v60 = vpack.c.bf16 %v930_v57, %v928_v56 }
 0x341   :  { %v949_v61 = vpack.c.bf16 %v931_v59, %v929_v58  ;;  %v895_v62 = vpop.f32.mrb[44].mxu0 }
 0x342   :  { %v896_v63 = vadd.f32 %v895_v62, %v1851_v22  ;;  %v897_v0 = vpop.f32.mrb[45].mxu0 }
 0x343   :  { %v898_v1 = vadd.f32 %v897_v0, %v1855_v30  ;;  %v899_v2 = vpop.f32.mrb[46].mxu0  ;;  %1167 = vmatprep.mubr.bf16.mxu1 %v949_v61 }
 0x344   :  { %v900_v3 = vadd.f32 %v899_v2, %v1851_v22  ;;  %v901_v4 = vpop.f32.mrb[47].mxu0  ;;  %1168 = vmatmul.mubr.bf16.gmra.mrb[56].mxu1 %v948_v60  ;;  %v932_v6 = vmax.f32 %v896_v63, 0.0 }
 0x345   :  { %v902_v5 = vadd.f32 %v901_v4, %v1855_v30  ;;  %v933_v8 = vmax.f32 %v898_v1, 0.0 }
 0x346   :  { %v934_v7 = vmax.f32 %v900_v3, 0.0 }
 0x347   :  { %v935_v9 = vmax.f32 %v902_v5, 0.0 }
 0x348   :  { %v950_v10 = vpack.c.bf16 %v934_v7, %v932_v6 }
 0x349   :  { %v951_v11 = vpack.c.bf16 %v935_v9, %v933_v8 }
 0x34b   :  { %1175 = vmatprep.mubr.bf16.mxu1 %v951_v11 }
 0x34c   :  { %1176 = vmatmul.mubr.bf16.gmra.mrb[60].mxu1 %v950_v10 }
 0x3e7   :  { %v1325_v12 = vpop.f32.mrb[32].mxu1 }
 0x3e8   :  { %v1326_v14 = vpop.f32.mrb[33].mxu1 }
 0x3e9   :  { %v1327_v22 = vadd.f32 %v1326_v14, %v1325_v12  ;;  %v1328_v15 = vpop.f32.mrb[34].mxu1 }
 0x3ea   :  { %v1329_v16 = vpop.f32.mrb[35].mxu1 }
 0x3eb   :  { %v1122_v30 = vadd.f32 %v1327_v22, %v1892_v13  ;;  %v1330_v48 = vadd.f32 %v1329_v16, %v1328_v15 }
 0x3ed   :  { %1184 = vst [vmem:[#allocation11] sm:$0xff] %v1122_v30  ;;  %v1125_v17 = vadd.f32 %v1330_v48, %v1892_v13 }
 0x3ef   :  { %1185 = vst [vmem:[#allocation11 + $0x8] sm:$0xff] %v1125_v17  ;;  %v1331_v18 = vpop.f32.mrb[36].mxu1 }
 0x3f0   :  { %v1332_v19 = vpop.f32.mrb[37].mxu1 }
 0x3f1   :  { %v1333_v20 = vadd.f32 %v1332_v19, %v1331_v18  ;;  %v1334_v21 = vpop.f32.mrb[38].mxu1 }
 0x3f2   :  { %v1335_v29 = vpop.f32.mrb[39].mxu1 }
 0x3f3   :  { %v1130_v23 = vadd.f32 %v1333_v20, %v1892_v13  ;;  %v1336_v24 = vadd.f32 %v1335_v29, %v1334_v21 }
 0x3f5   :  { %1186 = vst [vmem:[#allocation11 + $0x10] sm:$0xff] %v1130_v23  ;;  %v1133_v27 = vadd.f32 %v1336_v24, %v1892_v13 }
 0x3f7   :  { %1187 = vst [vmem:[#allocation11 + $0x18] sm:$0xff] %v1133_v27  ;;  %v1337_v31 = vpop.f32.mrb[40].mxu1 }
 0x3f8   :  { %v1338_v32 = vpop.f32.mrb[41].mxu1 }
 0x3f9   :  { %v1339_v33 = vadd.f32 %v1338_v32, %v1337_v31  ;;  %v1340_v34 = vpop.f32.mrb[42].mxu1 }
 0x3fa   :  { %v1341_v35 = vpop.f32.mrb[43].mxu1 }
 0x3fb   :  { %v1138_v36 = vadd.f32 %v1339_v33, %v1892_v13  ;;  %v1342_v37 = vadd.f32 %v1341_v35, %v1340_v34 }
 0x3fd   :  { %1188 = vst [vmem:[#allocation11 + $0x20] sm:$0xff] %v1138_v36  ;;  %v1141_v26 = vadd.f32 %v1342_v37, %v1892_v13 }
 0x3ff   :  { %1189 = vst [vmem:[#allocation11 + $0x28] sm:$0xff] %v1141_v26  ;;  %v1343_v38 = vpop.f32.mrb[44].mxu1 }
 0x400   :  { %v1344_v39 = vpop.f32.mrb[45].mxu1 }
 0x401   :  { %v1345_v25 = vadd.f32 %v1344_v39, %v1343_v38  ;;  %v1346_v28 = vpop.f32.mrb[46].mxu1 }
 0x402   :  { %v1347_v40 = vpop.f32.mrb[47].mxu1 }
 0x403   :  { %v1146_v41 = vadd.f32 %v1345_v25, %v1892_v13  ;;  %v1348_v42 = vadd.f32 %v1347_v40, %v1346_v28 }
 0x405   :  { %1190 = vst [vmem:[#allocation11 + $0x30] sm:$0xff] %v1146_v41  ;;  %v1149_v43 = vadd.f32 %v1348_v42, %v1892_v13 }
 0x407   :  { %1191 = vst [vmem:[#allocation11 + $0x38] sm:$0xff] %v1149_v43  ;;  %v1349_v44 = vpop.f32.mrb[48].mxu1 }
 0x408   :  { %v1350_v45 = vpop.f32.mrb[49].mxu1 }
 0x409   :  { %v1351_v46 = vadd.f32 %v1350_v45, %v1349_v44  ;;  %v1352_v47 = vpop.f32.mrb[50].mxu1 }
 0x40a   :  { %v1353_v49 = vpop.f32.mrb[51].mxu1 }
 0x40b   :  { %v1154_v50 = vadd.f32 %v1351_v46, %v1892_v13  ;;  %v1354_v51 = vadd.f32 %v1353_v49, %v1352_v47 }
 0x40d   :  { %1192 = vst [vmem:[#allocation11 + $0x40] sm:$0xff] %v1154_v50  ;;  %v1157_v52 = vadd.f32 %v1354_v51, %v1892_v13 }
 0x40f   :  { %1193 = vst [vmem:[#allocation11 + $0x48] sm:$0xff] %v1157_v52  ;;  %v1355_v53 = vpop.f32.mrb[52].mxu1 }
 0x410   :  { %v1356_v54 = vpop.f32.mrb[53].mxu1 }
 0x411   :  { %v1357_v55 = vadd.f32 %v1356_v54, %v1355_v53  ;;  %v1358_v56 = vpop.f32.mrb[54].mxu1 }
 0x412   :  { %v1359_v57 = vpop.f32.mrb[55].mxu1 }
 0x413   :  { %v1162_v58 = vadd.f32 %v1357_v55, %v1892_v13  ;;  %v1360_v59 = vadd.f32 %v1359_v57, %v1358_v56 }
 0x415   :  { %1194 = vst [vmem:[#allocation11 + $0x50] sm:$0xff] %v1162_v58  ;;  %v1165_v60 = vadd.f32 %v1360_v59, %v1892_v13 }
 0x417   :  { %1195 = vst [vmem:[#allocation11 + $0x58] sm:$0xff] %v1165_v60  ;;  %v1361_v61 = vpop.f32.mrb[56].mxu1 }
 0x418   :  { %v1362_v62 = vpop.f32.mrb[57].mxu1 }
 0x419   :  { %v1363_v63 = vadd.f32 %v1362_v62, %v1361_v61  ;;  %v1364_v0 = vpop.f32.mrb[58].mxu1 }
 0x41a   :  { %v1365_v1 = vpop.f32.mrb[59].mxu1 }
 0x41b   :  { %v1170_v2 = vadd.f32 %v1363_v63, %v1892_v13  ;;  %v1366_v3 = vadd.f32 %v1365_v1, %v1364_v0 }
 0x41d   :  { %1196 = vst [vmem:[#allocation11 + $0x60] sm:$0xff] %v1170_v2  ;;  %v1173_v4 = vadd.f32 %v1366_v3, %v1892_v13 }
 0x41f   :  { %1197 = vst [vmem:[#allocation11 + $0x68] sm:$0xff] %v1173_v4  ;;  %v1367_v5 = vpop.f32.mrb[60].mxu1 }
 0x420   :  { %v1368_v6 = vpop.f32.mrb[61].mxu1 }
 0x421   :  { %v1369_v7 = vadd.f32 %v1368_v6, %v1367_v5  ;;  %v1370_v8 = vpop.f32.mrb[62].mxu1 }
 0x422   :  { %v1371_v9 = vpop.f32.mrb[63].mxu1 }
 0x423   :  { %v1178_v10 = vadd.f32 %v1369_v7, %v1892_v13  ;;  %v1372_v11 = vadd.f32 %v1371_v9, %v1370_v8 }
 0x425   :  { %1198 = vst [vmem:[#allocation11 + $0x70] sm:$0xff] %v1178_v10  ;;  %v1181_v12 = vadd.f32 %v1372_v11, %v1892_v13 }
 0x427   :  { %1199 = vst [vmem:[#allocation11 + $0x78] sm:$0xff] %v1181_v12 }
 0x428   :  { %1633 = shalt.err (!%p1630_p2)
}
 0x429   :  { %s1634_s18 = scalar_lea.hbm %s1934_s9, 2048 }
 0x42a   :  { %p1635_p3 = scmp.ne.s32.totalorder %s1934_s9, %s1634_s18  ;;  %p1638_p4 = scmp.lt.u32.totalorder %s1634_s18, %s1934_s9 }
 0x42c   :  { %p1640_p5 = pnand %p1638_p4, %p1635_p3 }
 0x42e   :  { %1643 = shalt.err (!%p1640_p5)
}
 0x42f   :  { %1211 = dma.vmem_to_hbm [thread:$0]  %s1206_s1, 2048, %s1934_s9, [#allocation4], %s1657_s10, %s1657_s10, %s1658_s14  }
 0x430   :  { %1650 = dma.done.wait [#allocation4], 2048  }
 0x431   :  { %1651 = vsyncadd [#allocation4], 4294965248 }
 0x432   :  { %1215 = vsyncpa [#allocation3], 1 }
 0x433   :  { %1216 = vsyncpa [#allocation6], 1 }
 0x434   :  { %1217 = vsyncpa [#allocation9], 1 }
 0x435   :  { %1218 = vsyncpa [#allocation4], 1 }

</bundles_post_ra>
